<compile_context>
chip_gen: v6e
topology: v6e:2x2x1
jax: 0.10.0
libtpu: 0.0.40
codegen_flags: <defaults>
</compile_context>

<pallas_src>
import jax
import jax.numpy as jnp
from jax.experimental import pallas as pl
from jax.experimental.pallas import tpu as pltpu

_MIB = 1 << 20


def _round_up(v, m):
    return ((v + m - 1) // m) * m


def _tpu_generation():
    try:
        kind = jax.devices()[0].device_kind.lower()
    except Exception:
        return 6
    for g in (7, 6, 5, 4):
        if f"v{g}" in kind:
            return g
    return 6


def _physical_vmem_bytes(gen):
    try:
        return int(pltpu.get_tpu_info().vmem_capacity_bytes)
    except Exception:
        # v7x: 64 MiB per TensorCore; v4/v5e/v6e: 128 MiB.
        return (64 if gen >= 7 else 128) * _MIB


# ----------------------------------------------------------------------------
# Kernels
# ----------------------------------------------------------------------------
def _mlp_resident_kernel(x_ref, w1_ref, b1_ref, w2_ref, b2_ref, o_ref):
    # Weights are full-extent blocks with constant index maps -> DMA'd once,
    # resident in VMEM across all batch tiles. Whole hid reduction in one step.
    h = jnp.dot(x_ref[...], w1_ref[...], preferred_element_type=jnp.float32)
    h = jnp.maximum(h + b1_ref[...], 0.0)                      # ReLU (f32)
    y = jnp.dot(h.astype(w2_ref.dtype), w2_ref[...],
                preferred_element_type=jnp.float32)
    o_ref[...] = (y + b2_ref[...]).astype(o_ref.dtype)


def _mlp_streaming_kernel(x_ref, w1_ref, b1_ref, w2_ref, b2_ref, o_ref, acc_ref):
    # Grid: (batch_tiles, hid_tiles); hid is the trailing reduction axis.
    k = pl.program_id(1)

    @pl.when(k == 0)
    def _():
        acc_ref[...] = jnp.zeros_like(acc_ref)

    # First linear on this hid slice (full in_p reduction inside the step, so
    # applying ReLU per hid slice is exact).
    h = jnp.dot(x_ref[...], w1_ref[...], preferred_element_type=jnp.float32)
    h = jnp.maximum(h + b1_ref[...], 0.0)
    acc_ref[...] += jnp.dot(h.astype(w2_ref.dtype), w2_ref[...],
                            preferred_element_type=jnp.float32)

    @pl.when(k == pl.num_programs(1) - 1)
    def _():
        o_ref[...] = (acc_ref[...] + b2_ref[...]).astype(o_ref.dtype)


# ----------------------------------------------------------------------------
# Parameter preparation (done ONCE, hoisted out of the forward path)
# ----------------------------------------------------------------------------
def prepare_mlp_params(w1, b1, w2, b2, *, force_streaming=False):
    """Pad/cast nn.Linear weights once and pick the execution strategy.

    w1: (in_dim, hid_dim), b1: (hid_dim,), w2: (hid_dim, out_dim), b2: (out_dim,)
    (weights are stored as the transpose of PyTorch's (out, in) layout).
    Zero padding is exact: padded input cols contribute 0, padded hidden units
    hit zero rows of W2, padded output cols are sliced off by the wrapper.
    """
    in_dim, hid_dim = w1.shape
    out_dim = w2.shape[1]

    gen = _tpu_generation()
    vmem_phys = _physical_vmem_bytes(gen)

    in_p = _round_up(in_dim, 128)
    out_p = _round_up(out_dim, 128)
    hid_128 = _round_up(hid_dim, 128)

    # Resident-vs-streaming decision: hold W1+W2 in VMEM whenever they fit a
    # per-generation budget (leaves headroom for x/out double-buffers and the
    # f32 intermediate). 44 MiB on v7x (64 MiB/TC, duplicated per core),
    # ~80 MiB on v5e/v6e (128 MiB).
    weight_bytes = (in_p * hid_128 + hid_128 * out_p) * 2  # bf16
    resident_budget = 44 * _MIB if gen >= 7 else 80 * _MIB
    resident = (not force_streaming) and weight_bytes <= resident_budget

    if resident:
        tile_h = hid_128
        hid_p = hid_128
    else:
        # Large hid tiles => fewer grid steps and fewer f32-accumulator RMW
        # passes. Pad hid UP to a tile_h multiple instead of shrinking tile_h.
        tile_h = min(2048, hid_128)
        slice_budget = int(0.35 * vmem_phys)  # double-buffered W1/W2 slices
        while tile_h > 512 and 2 * (in_p + out_p) * tile_h * 2 > slice_budget:
            tile_h //= 2
        hid_p = _round_up(hid_128, tile_h)

    # Pad + cast once (this full read/write of the weights is paid at init,
    # not on every forward call).
    w1p = jnp.zeros((in_p, hid_p), jnp.bfloat16).at[:in_dim, :hid_dim].set(
        w1.astype(jnp.bfloat16))
    w2p = jnp.zeros((hid_p, out_p), jnp.bfloat16).at[:hid_dim, :out_dim].set(
        w2.astype(jnp.bfloat16))
    b1p = jnp.zeros((1, hid_p), jnp.float32).at[:, :hid_dim].set(
        jnp.reshape(b1, (1, -1)).astype(jnp.float32))
    b2p = jnp.zeros((1, out_p), jnp.float32).at[:, :out_dim].set(
        jnp.reshape(b2, (1, -1)).astype(jnp.float32))

    params = dict(w1=w1p, b1=b1p, w2=w2p, b2=b2p)
    config = dict(in_dim=in_dim, hid_dim=hid_dim, out_dim=out_dim,
                  in_p=in_p, hid_p=hid_p, out_p=out_p,
                  tile_h=tile_h, resident=resident,
                  gen=gen, vmem_phys=vmem_phys)
    return params, config


# ----------------------------------------------------------------------------
# Forward
# ----------------------------------------------------------------------------
def mlp_forward(x, params, config, *, tile_b=None):
    """y = relu(x @ w1 + b1) @ w2 + b2 using pre-padded params from prepare_mlp_params."""
    B, in_dim = x.shape
    assert in_dim == config["in_dim"], "input feature dim mismatch"
    in_p, hid_p, out_p = config["in_p"], config["hid_p"], config["out_p"]
    out_dim = config["out_dim"]
    tile_h = config["tile_h"]
    resident = config["resident"]
    gen = config["gen"]
    vmem_phys = config["vmem_phys"]

    out_dtype = x.dtype
    out_sz = jnp.dtype(out_dtype).itemsize

    if tile_b is None:
        # Streaming AI ~ tile_b FLOP/byte; v6e ridge ~650 -> 1024, v7x ~310 and
        # v5e ~240 -> 512 is enough (and kinder to v7x's 64 MiB VMEM).
        tile_b = 1024 if (not resident and gen == 6) else 512
    tile_b = max(8, min(tile_b, _round_up(B, 8)))
    tile_b = _round_up(tile_b, 8)

    def vmem_estimate(tb):
        est = 2 * tb * in_p * 2 + 2 * tb * out_p * out_sz          # x, out dbl-buf
        est += (hid_p + out_p) * 4 * 2                             # biases
        if resident:
            est += (in_p * hid_p + hid_p * out_p) * 2              # resident W1+W2
            est += tb * hid_p * (4 + 2)                            # h (f32 + bf16 cast)
        else:
            est += 2 * (in_p * tile_h + tile_h * out_p) * 2        # W1/W2 slices dbl-buf
            est += tb * out_p * 4                                  # f32 accumulator
            est += tb * tile_h * (4 + 2)                           # h (f32 + bf16 cast)
        return est

    budget = int(0.85 * vmem_phys)
    while tile_b > 256 and vmem_estimate(tile_b) > budget:
        tile_b //= 2
    tile_b = _round_up(tile_b, 8)

    B_p = _round_up(B, tile_b)
    n_bt = B_p // tile_b
    n_ht = hid_p // tile_h

    # x: pad/cast only when needed (bf16 cast is required for the MXU anyway).
    if B_p == B and in_p == in_dim and x.dtype == jnp.bfloat16:
        xb = x
    elif B_p == B and in_p == in_dim:
        xb = x.astype(jnp.bfloat16)
    else:
        xb = jnp.zeros((B_p, in_p), jnp.bfloat16).at[:B, :in_dim].set(
            x.astype(jnp.bfloat16))

    w1p, b1p, w2p, b2p = params["w1"], params["b1"], params["w2"], params["b2"]

    weight_bytes = (w1p.size + w2p.size) * 2
    bias_bytes = (b1p.size + b2p.size) * 4
    cost = pl.CostEstimate(
        flops=2 * B_p * hid_p * (in_p + out_p),
        transcendentals=0,
        # x tiles are fetched once per batch tile (block index is hid-invariant);
        # weights are fetched once when resident, n_bt times when streamed.
        bytes_accessed=(B_p * in_p * 2
                        + weight_bytes * (1 if resident else n_bt)
                        + bias_bytes
                        + B_p * out_p * out_sz),
    )

    vmem_limit = min(vmem_phys - 2 * _MIB,
                     max(32 * _MIB, int(1.25 * vmem_estimate(tile_b))))
    compiler_params = pltpu.CompilerParams(
        dimension_semantics=("parallel",) if resident else ("parallel", "arbitrary"),
        vmem_limit_bytes=int(vmem_limit),
    )

    if resident:
        out_padded = pl.pallas_call(
            _mlp_resident_kernel,
            out_shape=jax.ShapeDtypeStruct((B_p, out_p), out_dtype),
            grid_spec=pltpu.PrefetchScalarGridSpec(
                num_scalar_prefetch=0,
                grid=(n_bt,),
                in_specs=[
                    pl.BlockSpec((tile_b, in_p), lambda i: (i, 0)),    # x tile
                    pl.BlockSpec((in_p, hid_p), lambda i: (0, 0)),     # W1 (resident)
                    pl.BlockSpec((1, hid_p), lambda i: (0, 0)),        # b1
                    pl.BlockSpec((hid_p, out_p), lambda i: (0, 0)),    # W2 (resident)
                    pl.BlockSpec((1, out_p), lambda i: (0, 0)),        # b2
                ],
                out_specs=pl.BlockSpec((tile_b, out_p), lambda i: (i, 0)),
            ),
            compiler_params=compiler_params,
            cost_estimate=cost,
        )(xb, w1p, b1p, w2p, b2p)
    else:
        out_padded = pl.pallas_call(
            _mlp_streaming_kernel,
            out_shape=jax.ShapeDtypeStruct((B_p, out_p), out_dtype),
            grid_spec=pltpu.PrefetchScalarGridSpec(
                num_scalar_prefetch=0,
                grid=(n_bt, n_ht),
                in_specs=[
                    pl.BlockSpec((tile_b, in_p), lambda i, k: (i, 0)),    # x tile
                    pl.BlockSpec((in_p, tile_h), lambda i, k: (0, k)),    # W1 slice
                    pl.BlockSpec((1, tile_h), lambda i, k: (0, k)),       # b1 slice
                    pl.BlockSpec((tile_h, out_p), lambda i, k: (k, 0)),   # W2 slice
                    pl.BlockSpec((1, out_p), lambda i, k: (0, 0)),        # b2
                ],
                out_specs=pl.BlockSpec((tile_b, out_p), lambda i, k: (i, 0)),
                scratch_shapes=[pltpu.VMEM((tile_b, out_p), jnp.float32)],
            ),
            compiler_params=compiler_params,
            cost_estimate=cost,
        )(xb, w1p, b1p, w2p, b2p)

    return out_padded[:B, :out_dim]


# ----------------------------------------------------------------------------
# Demo / correctness check
# ----------------------------------------------------------------------------
def init_mlp_params(key, in_dim, hid_dim, out_dim, dtype=jnp.float32):
    # Mirrors nn.Linear's uniform(-1/sqrt(fan_in), 1/sqrt(fan_in)) init.
    # Stored as (in, out) = transpose of PyTorch's (out, in) weight layout.
    k1, k2, k3, k4 = jax.random.split(key, 4)
    lim1 = 1.0 / (in_dim ** 0.5)
    lim2 = 1.0 / (hid_dim ** 0.5)
    w1 = jax.random.uniform(k1, (in_dim, hid_dim), dtype, -lim1, lim1)
    b1 = jax.random.uniform(k2, (hid_dim,), dtype, -lim1, lim1)
    w2 = jax.random.uniform(k3, (hid_dim, out_dim), dtype, -lim2, lim2)
    b2 = jax.random.uniform(k4, (out_dim,), dtype, -lim2, lim2)
    return w1, b1, w2, b2


if __name__ == "__main__":
    # Small demo shapes consistent with the MLP module (internally padded to
    # 128-lane multiples by the wrapper).
    in_dim, hid_dim, out_dim = 32, 64, 16
    batch = 16

    key = jax.random.PRNGKey(0)
    kx, kp = jax.random.split(key)
    x = jax.random.normal(kx, (batch, in_dim), jnp.float32)
    w1, b1, w2, b2 = init_mlp_params(kp, in_dim, hid_dim, out_dim)

    # Pure-JAX f32 reference. Kernel uses bf16 MXU operands with f32
    # accumulation (documented policy), so tolerance is relaxed accordingly.
    ref = jnp.maximum(x @ w1 + b1[None, :], 0.0) @ w2 + b2[None, :]

    # Default (resident-weight) path: weights padded/cast once, stay in VMEM.
    params_r, cfg_r = prepare_mlp_params(w1, b1, w2, b2)
    out_r = jax.block_until_ready(mlp_forward(x, params_r, cfg_r))
    assert out_r.shape == (batch, out_dim)
    assert jnp.allclose(out_r, ref, atol=5e-2, rtol=5e-2), "resident path mismatch"

    # Streaming (hid-tiled) fallback path, exercised explicitly for coverage.
    params_s, cfg_s = prepare_mlp_params(w1, b1, w2, b2, force_streaming=True)
    out_s = jax.block_until_ready(mlp_forward(x, params_s, cfg_s))
    assert out_s.shape == (batch, out_dim)
    assert jnp.allclose(out_s, ref, atol=5e-2, rtol=5e-2), "streaming path mismatch"

    print("KERNEL_OK")
</pallas_src>

<mosaic_0001>
module attributes {stable_mosaic.version = 11 : i64} {
  func.func @_mlp_resident_kernel(%arg0: i32, %arg1: memref<16x128xbf16, #tpu.memory_space<vmem>>, %arg2: memref<128x128xbf16, #tpu.memory_space<vmem>>, %arg3: memref<1x128xf32, #tpu.memory_space<vmem>>, %arg4: memref<128x128xbf16, #tpu.memory_space<vmem>>, %arg5: memref<1x128xf32, #tpu.memory_space<vmem>>, %arg6: memref<16x128xf32, #tpu.memory_space<vmem>>) attributes {dimension_semantics = [#tpu.dimension_semantics<parallel>], iteration_bounds = array<i64: 1>, scalar_prefetch = 0 : i64, scratch_operands = 0 : i64, tpu.core_type = #tpu.core_type<tc>, window_params = [{transform_indices = @transform_0, window_bounds = array<i64: 16, 128>}, {pipeline_mode = #tpu.pipeline_mode<synchronous>, transform_indices = @transform_1, window_bounds = array<i64: 128, 128>}, {pipeline_mode = #tpu.pipeline_mode<synchronous>, transform_indices = @transform_2, window_bounds = array<i64: 1, 128>}, {pipeline_mode = #tpu.pipeline_mode<synchronous>, transform_indices = @transform_3, window_bounds = array<i64: 128, 128>}, {pipeline_mode = #tpu.pipeline_mode<synchronous>, transform_indices = @transform_4, window_bounds = array<i64: 1, 128>}, {transform_indices = @transform_5, window_bounds = array<i64: 16, 128>}]} {
    %c0 = arith.constant 0 : index
    %c0_0 = arith.constant 0 : index
    %0 = vector.load %arg1[%c0, %c0_0] : memref<16x128xbf16, #tpu.memory_space<vmem>>, vector<16x128xbf16>
    %c0_1 = arith.constant 0 : index
    %c0_2 = arith.constant 0 : index
    %1 = vector.load %arg2[%c0_1, %c0_2] : memref<128x128xbf16, #tpu.memory_space<vmem>>, vector<128x128xbf16>
    %cst = arith.constant dense<0.000000e+00> : vector<16x128xf32>
    %2 = tpu.matmul %0, %1, %cst {dimension_numbers = #tpu.dot_dimension_numbers<[1], [0], [0], [1], [0, 0, 1, 1], [], []>} : vector<16x128xbf16>, vector<128x128xbf16>, vector<16x128xf32> -> vector<16x128xf32>
    %c0_3 = arith.constant 0 : index
    %c0_4 = arith.constant 0 : index
    %3 = vector.load %arg3[%c0_3, %c0_4] : memref<1x128xf32, #tpu.memory_space<vmem>>, vector<1x128xf32>
    %4 = vector.broadcast %3 : vector<1x128xf32> to vector<16x128xf32>
    %5 = arith.addf %2, %4 : vector<16x128xf32>
    %cst_5 = arith.constant 0.000000e+00 : f32
    %6 = vector.broadcast %cst_5 : f32 to vector<16x128xf32>
    %7 = arith.maximumf %5, %6 : vector<16x128xf32>
    %8 = arith.truncf %7 : vector<16x128xf32> to vector<16x128xbf16>
    %c0_6 = arith.constant 0 : index
    %c0_7 = arith.constant 0 : index
    %9 = vector.load %arg4[%c0_6, %c0_7] : memref<128x128xbf16, #tpu.memory_space<vmem>>, vector<128x128xbf16>
    %cst_8 = arith.constant dense<0.000000e+00> : vector<16x128xf32>
    %10 = tpu.matmul %8, %9, %cst_8 {dimension_numbers = #tpu.dot_dimension_numbers<[1], [0], [0], [1], [0, 0, 1, 1], [], []>} : vector<16x128xbf16>, vector<128x128xbf16>, vector<16x128xf32> -> vector<16x128xf32>
    %c0_9 = arith.constant 0 : index
    %c0_10 = arith.constant 0 : index
    %11 = vector.load %arg5[%c0_9, %c0_10] : memref<1x128xf32, #tpu.memory_space<vmem>>, vector<1x128xf32>
    %12 = vector.broadcast %11 : vector<1x128xf32> to vector<16x128xf32>
    %13 = arith.addf %10, %12 : vector<16x128xf32>
    %c0_11 = arith.constant 0 : index
    %c0_12 = arith.constant 0 : index
    %14 = vector.load %arg6[%c0_11, %c0_12] : memref<16x128xf32, #tpu.memory_space<vmem>>, vector<16x128xf32>
    tpu.vector_store %arg6[%c0_11, %c0_12], %13 {strides = array<i32>} : memref<16x128xf32, #tpu.memory_space<vmem>>, vector<16x128xf32>,
    return
  }
  func.func @transform_0(%arg0: i32) -> (i32, i32) {
    %c0_i32 = arith.constant 0 : i32
    %c0_i32_0 = arith.constant 0 : i32
    return %arg0, %c0_i32 : i32, i32
  }
  func.func @transform_1(%arg0: i32) -> (i32, i32) {
    %c0_i32 = arith.constant 0 : i32
    %c0_i32_0 = arith.constant 0 : i32
    %c0_i32_1 = arith.constant 0 : i32
    return %c0_i32, %c0_i32_0 : i32, i32
  }
  func.func @transform_2(%arg0: i32) -> (i32, i32) {
    %c0_i32 = arith.constant 0 : i32
    %c0_i32_0 = arith.constant 0 : i32
    %c0_i32_1 = arith.constant 0 : i32
    return %c0_i32, %c0_i32_0 : i32, i32
  }
  func.func @transform_3(%arg0: i32) -> (i32, i32) {
    %c0_i32 = arith.constant 0 : i32
    %c0_i32_0 = arith.constant 0 : i32
    %c0_i32_1 = arith.constant 0 : i32
    return %c0_i32, %c0_i32_0 : i32, i32
  }
  func.func @transform_4(%arg0: i32) -> (i32, i32) {
    %c0_i32 = arith.constant 0 : i32
    %c0_i32_0 = arith.constant 0 : i32
    %c0_i32_1 = arith.constant 0 : i32
    return %c0_i32, %c0_i32_0 : i32, i32
  }
  func.func @transform_5(%arg0: i32) -> (i32, i32) {
    %c0_i32 = arith.constant 0 : i32
    %c0_i32_0 = arith.constant 0 : i32
    return %arg0, %c0_i32 : i32, i32
  }
}

</mosaic_0001>

<bundles_post_ra>
// kernel: tpu_custom_call.1
= control target key start
LH: loop header
LB: loop body
LE: loop exit
PB: predicated region body
PF: predicated region fallthrough
CT: control target
= control target key end

     0   :  { %10 = vsyncpa [#allocation3], 0  ;;  %s566_s0 = inlined_call_operand.hbm [shape: bf16[16,128], index: 0, kind: input, shape index: {}]   ;;  %s567_s1 = inlined_call_operand.hbm [shape: bf16[128,128], index: 1, kind: input, shape index: {}]   ;;  %s568_s2 = inlined_call_operand.vmem [shape: f32[1,128], index: 2, kind: input, shape index: {}]   ;;  %s569_s3 = inlined_call_operand.hbm [shape: bf16[128,128], index: 3, kind: input, shape index: {}]   ;;  %s570_s4 = inlined_call_operand.vmem [shape: f32[1,128], index: 4, kind: input, shape index: {}]   ;;  %s571_s5 = inlined_call_operand.hbm [shape: f32[16,128], index: 5, kind: output, shape index: {}]  }
   0x1   :  { %11 = vsyncpa [#allocation6], 0 }
   0x2   :  { %12 = vsyncpa [#allocation4], 0  ;;  %s508_s18 = smov [#allocation5]   ;;  %s509_s20 = smov [#allocation2]  }
   0x3   :  { %s30_s19 = sshll.u32 %s508_s18, 4  ;;  %s18_s21 = sshll.u32 %s509_s20, 4  ;;  %s31_s19 = int_to_ptr.vmem [resolvable:$true] %s30_s19  ;;  %s19_s21 = int_to_ptr.vmem [resolvable:$true] %s18_s21 }
   0x4   :  { %s430_s22 = scalar_lea.vmem %s31_s19, 1024  ;;  %p435_p1 = scmp.lt.s32.totalorder %s31_s19, %s31_s19 }
   0x5   :  { %p431_p0 = scmp.ne.s32.totalorder %s31_s19, %s430_s22  ;;  %p436_p2 = scmp.lt.s32.totalorder %s430_s22, %s430_s22 }
   0x7   :  { %p437_p3 = por %p436_p2, %p435_p1 }
   0x9   :  { %p438_p4 = pnand %p437_p3, %p431_p0 }
   0xb   :  { %441 = shalt.err (!%p438_p4)
}
   0xc   :  { %s510_s23 = smov 64   ;;  %s511_s24 = smov 4  }
   0xd   :  { %36 = dma.hbm_to_vmem [thread:$0]  %s567_s1, 1024, %s31_s19, [#allocation6], %s510_s23, %s510_s23, %s511_s24  }
   0xe   :  { %s450_s27 = scalar_lea.vmem %s19_s21, 128  ;;  %p455_p6 = scmp.lt.s32.totalorder %s19_s21, %s19_s21 }
   0xf   :  { %p451_p5 = scmp.ne.s32.totalorder %s19_s21, %s450_s27  ;;  %p456_p7 = scmp.lt.s32.totalorder %s450_s27, %s450_s27 }
  0x11   :  { %p457_p8 = por %p456_p7, %p455_p6 }
  0x13   :  { %p458_p9 = pnand %p457_p8, %p451_p5 }
  0x15   :  { %461 = shalt.err (!%p458_p9)
}
  0x16   :  { %24 = dma.hbm_to_vmem [thread:$0]  %s566_s0, 128, %s19_s21, [#allocation3], %s510_s23, %s510_s23, %s511_s24  }
  0x17   :  { %s512_s30 = smov [#allocation7]  }
  0x18   :  { %s44_s6 = sshll.u32 %s512_s30, 4  ;;  %s45_s6 = int_to_ptr.vmem [resolvable:$true] %s44_s6 }
  0x19   :  { %s470_s7 = scalar_lea.vmem %s45_s6, 1024  ;;  %p475_p11 = scmp.lt.s32.totalorder %s45_s6, %s45_s6 }
  0x1a   :  { %p471_p10 = scmp.ne.s32.totalorder %s45_s6, %s470_s7  ;;  %p476_p12 = scmp.lt.s32.totalorder %s470_s7, %s470_s7 }
  0x1c   :  { %p477_p13 = por %p476_p12, %p475_p11 }
  0x1e   :  { %p478_p0 = pnand %p477_p13, %p471_p10 }
  0x20   :  { %481 = shalt.err (!%p478_p0)
}
  0x21   :  { %50 = dma.hbm_to_vmem [thread:$0]  %s569_s3, 1024, %s45_s6, [#allocation6], %s510_s23, %s510_s23, %s511_s24  }
  0x22   :  { %502 = dma.done.wait [#allocation3], 128  }
  0x23   :  { %503 = vsyncadd [#allocation3], 4294967168 }
  0x24   :  { %504 = dma.done.wait [#allocation6], 2048  }
  0x25   :  { %505 = vsyncadd [#allocation6], 4294965248  ;;  %v513_v0 = vmov 0.0   ;;  %vm514_vm0 = vmmov 0   ;;  %v405_v1 = vld [vmem:[#allocation5 + $0x38] sm:$0xff]   ;;  %v406_v2 = vld [vmem:[#allocation5 + $0x30] sm:$0xff]  }
  0x26   :  { %355 = vmatprep.subr.bf16.mxu0 %v513_v0  ;;  %371 = vmatprep.mubr.msk.bf16.mxu0 %vm514_vm0, %v513_v0  ;;  %v407_v3 = vld [vmem:[#allocation5 + $0x28] sm:$0xff]   ;;  %v414_v4 = vld [vmem:[#allocation7 + $0x38] sm:$0xff]   ;;  %v408_v5 = vld [vmem:[#allocation5 + $0x20] sm:$0xff]   ;;  %s515_s11 = smov [#allocation8]  }
  0x27   :  { %375 = vmatprep.subr.bf16.mxu1 %v513_v0  ;;  %391 = vmatprep.mubr.msk.bf16.mxu1 %vm514_vm0, %v513_v0  ;;  %v415_v6 = vld [vmem:[#allocation7 + $0x30] sm:$0xff]   ;;  %v409_v7 = vld [vmem:[#allocation5 + $0x18] sm:$0xff]   ;;  %v416_v8 = vld [vmem:[#allocation7 + $0x28] sm:$0xff]   ;;  %s305_s12 = sshll.u32 %s515_s11, 4  ;;  %s306_s12 = int_to_ptr.vmem [resolvable:$true] %s305_s12 }
  0x28   :  { %356 = vmatpush3.bf16.msra.mxu0 %v405_v1  ;;  %376 = vmatpush3.bf16.msra.mxu1 %v414_v4  ;;  %v410_v9 = vld [vmem:[#allocation5 + $0x10] sm:$0xff]   ;;  %v417_v10 = vld [vmem:[#allocation7 + $0x20] sm:$0xff]   ;;  %v411_v11 = vld [vmem:[#allocation5 + $0x8] sm:$0xff]   ;;  %p487_p2 = scmp.lt.s32.totalorder %s306_s12, %s306_s12 }
  0x29   :  { %357 = vmatprep.subr.bf16.mxu0 %v513_v0  ;;  %377 = vmatprep.subr.bf16.mxu1 %v513_v0  ;;  %v418_v12 = vld [vmem:[#allocation7 + $0x18] sm:$0xff]   ;;  %v412_v13 = vld [vmem:[#allocation5] sm:$0xff]   ;;  %v419_v15 = vld [vmem:[#allocation7 + $0x10] sm:$0xff]  }
  0x2a   :  { %v413_v14 = vld [vmem:[#allocation2] sm:$0xff]   ;;  %v420_v16 = vld [vmem:[#allocation7 + $0x8] sm:$0xff]   ;;  %v421_v17 = vld [vmem:[#allocation7] sm:$0xff]  }
  0x2b   :  { %v318_v18 = vld [vmem:[%s568_s2] ss:$0 sm:$0xff]  ;;  %s482_s2 = scalar_lea.vmem %s306_s12, 256 }
  0x2c   :  { %358 = vmatpush3.bf16.msra.mxu0 %v406_v2  ;;  %378 = vmatpush3.bf16.msra.mxu1 %v415_v6  ;;  %v328_v28 = vld [vmem:[%s570_s4] ss:$0 sm:$0xff]  ;;  %p483_p1 = scmp.ne.s32.totalorder %s306_s12, %s482_s2  ;;  %p488_p3 = scmp.lt.s32.totalorder %s482_s2, %s482_s2 }
  0x2d   :  { %359 = vmatprep.subr.bf16.mxu0 %v513_v0  ;;  %379 = vmatprep.subr.bf16.mxu1 %v513_v0 }
  0x2e   :  { %p489_p4 = por %p488_p3, %p487_p2 }
  0x30   :  { %360 = vmatpush3.bf16.msra.mxu0 %v407_v3  ;;  %380 = vmatpush3.bf16.msra.mxu1 %v416_v8  ;;  %p490_p5 = pnand %p489_p4, %p483_p1 }
  0x31   :  { %361 = vmatprep.subr.bf16.mxu0 %v513_v0  ;;  %381 = vmatprep.subr.bf16.mxu1 %v513_v0 }
  0x34   :  { %362 = vmatpush3.bf16.msra.mxu0 %v408_v5  ;;  %382 = vmatpush3.bf16.msra.mxu1 %v417_v10 }
  0x35   :  { %363 = vmatprep.subr.bf16.mxu0 %v513_v0  ;;  %383 = vmatprep.subr.bf16.mxu1 %v513_v0 }
  0x38   :  { %364 = vmatpush3.bf16.msra.mxu0 %v409_v7  ;;  %384 = vmatpush3.bf16.msra.mxu1 %v418_v12 }
  0x39   :  { %365 = vmatprep.subr.bf16.mxu0 %v513_v0  ;;  %385 = vmatprep.subr.bf16.mxu1 %v513_v0 }
  0x3c   :  { %366 = vmatpush3.bf16.msra.mxu0 %v410_v9  ;;  %386 = vmatpush3.bf16.msra.mxu1 %v419_v15 }
  0x3d   :  { %367 = vmatprep.subr.bf16.mxu0 %v513_v0  ;;  %387 = vmatprep.subr.bf16.mxu1 %v513_v0 }
  0x40   :  { %368 = vmatpush3.bf16.msra.mxu0 %v411_v11  ;;  %388 = vmatpush3.bf16.msra.mxu1 %v420_v16 }
  0x41   :  { %369 = vmatprep.subr.bf16.mxu0 %v513_v0  ;;  %389 = vmatprep.subr.bf16.mxu1 %v513_v0 }
  0x44   :  { %370 = vmatpush3.bf16.msra.mxu0 %v412_v13  ;;  %390 = vmatpush3.bf16.msra.mxu1 %v421_v17 }
  0x47   :  { %372 = vmatmul.mubr.bf16.vlgmr.msra.gmra.mxu0 %v413_v14 }
 0x107   :  { %v176_v19 = vpop.f32.mrf.mxu0 }
 0x108   :  { %v177_v21 = vadd.f32 %v318_v18, %v176_v19 }
 0x109   :  { %v373_v20 = vpop.f32.mrf.mxu0 }
 0x10a   :  { %v183_v25 = vmax.f32 %v177_v21, 0.0 }
 0x10b   :  { %v179_v22 = vpop.f32.mrf.mxu0 }
 0x10c   :  { %v180_v23 = vadd.f32 %v318_v18, %v179_v22 }
 0x10d   :  { %v374_v24 = vpop.f32.mrf.mxu0 }
 0x10e   :  { %v184_v26 = vmax.f32 %v180_v23, 0.0 }
 0x110   :  { %v185_v27 = vpack.c.bf16 %v184_v26, %v183_v25 }
 0x112   :  { %392 = vmatmul.mubr.bf16.vlgmr.msra.gmra.mxu1 %v185_v27 }
 0x1d2   :  { %v291_v29 = vpop.f32.mrf.mxu1 }
 0x1d3   :  { %v292_v30 = vadd.f32 %v328_v28, %v291_v29 }
 0x1d4   :  { %v393_v31 = vpop.f32.mrf.mxu1 }
 0x1d5   :  { %298 = vst [vmem:[#allocation8] sm:$0xff] %v292_v30 }
 0x1d6   :  { %v294_v32 = vpop.f32.mrf.mxu1 }
 0x1d7   :  { %v295_v33 = vadd.f32 %v328_v28, %v294_v32 }
 0x1d8   :  { %v394_v34 = vpop.f32.mrf.mxu1 }
 0x1d9   :  { %299 = vst [vmem:[#allocation8 + $0x8] sm:$0xff] %v295_v33 }
 0x1da   :  { %493 = shalt.err (!%p490_p5)
}
 0x1db   :  { %s516_s13 = smov 128   ;;  %s517_s4 = smov 8  }
 0x1dc   :  { %311 = dma.vmem_to_hbm [thread:$0]  %s306_s12, 256, %s571_s5, [#allocation4], %s516_s13, %s516_s13, %s517_s4  }
 0x1dd   :  { %506 = dma.done.wait [#allocation4], 256  }
 0x1de   :  { %507 = vsyncadd [#allocation4], 4294967040 }
 0x1df   :  { %315 = vsyncpa [#allocation3], 1 }
 0x1e0   :  { %316 = vsyncpa [#allocation6], 1 }
 0x1e1   :  { %317 = vsyncpa [#allocation4], 1 }

</bundles_post_ra>
